<compile_context>
chip_gen: v6e
topology: v6e:2x2x1
jax: 0.10.0
libtpu: 0.0.40
codegen_flags: <defaults>
</compile_context>

<pallas_src>
import functools

import jax
import jax.numpy as jnp
from jax.experimental import pallas as pl
from jax.experimental.pallas import tpu as pltpu

_LANES = 128
_TARGET_COLS = 8192                     # lane-dense slab width cap (mult. of 128)
_TARGET_BLOCK_BYTES = 2 * 1024 * 1024   # ~2 MiB/buffer: safe on v5e/v6e/v7x defaults


def _round_up(a: int, b: int) -> int:
    return -(-a // b) * b


def _cdiv(a: int, b: int) -> int:
    return -(-a // b)


def _choose_slab(total: int) -> tuple[int, int, int]:
    """Pick a lane-dense (rows, cols) slab; returns (rows, cols, padded_total)."""
    if total % _LANES == 0:
        # Choose cols as the largest 128-multiple divisor of `total` that is
        # <= _TARGET_COLS  -> exact factorization, zero padding.
        units = total // _LANES
        best = 1
        d = 1
        while d * d <= units:
            if units % d == 0:
                for c in (d, units // d):
                    if c * _LANES <= _TARGET_COLS and c > best:
                        best = c
            d += 1
        cols = best * _LANES
        rows = total // cols
        return rows, cols, total
    # Non-128-divisible total: pad only up to the next multiple of cols
    # (< cols extra elements), never to a block multiple.
    if total <= _TARGET_COLS:
        cols = _round_up(total, _LANES)
        rows = 1
    else:
        cols = _TARGET_COLS
        rows = _cdiv(total, cols)
    return rows, cols, rows * cols


def _identity_kernel(x_ref, o_ref):
    # Pure pass-through on the current VMEM tile.
    o_ref[...] = x_ref[...]


@functools.partial(jax.jit, static_argnames=())
def _pallas_identity(x: jax.Array) -> jax.Array:
    """Identity pass of an arbitrary-shape array through a Pallas TPU kernel."""
    orig_shape = x.shape
    total = x.size
    if total == 0:
        return x

    itemsize = jnp.dtype(x.dtype).itemsize
    # Native packed sublane tile: 8 rows (4B), 16 rows (2B), 32 rows (1B dtypes).
    sublane = max(8, 32 // max(1, itemsize))

    rows, cols, padded = _choose_slab(total)

    flat = x.reshape(-1)
    if padded != total:
        flat = jnp.pad(flat, (0, padded - total))
    x2d = flat.reshape(rows, cols)

    # Block rows: as many sublane-multiples as fit the target block bytes.
    max_block_rows = max(
        sublane,
        (_TARGET_BLOCK_BYTES // (cols * itemsize)) // sublane * sublane,
    )
    if rows <= max_block_rows:
        block_rows = rows          # single step; block dim == full array dim
    else:
        block_rows = max_block_rows  # sublane multiple; partial last step is masked

    grid = (pl.cdiv(rows, block_rows),)

    y2d = pl.pallas_call(
        _identity_kernel,
        out_shape=jax.ShapeDtypeStruct((rows, cols), x2d.dtype),
        grid=grid,
        in_specs=[pl.BlockSpec((block_rows, cols), lambda i: (i, 0))],
        out_specs=pl.BlockSpec((block_rows, cols), lambda i: (i, 0)),
        compiler_params=pltpu.CompilerParams(
            dimension_semantics=("parallel",),
        ),
    )(x2d)

    out = y2d.reshape(-1)
    if padded != total:
        out = out[:total]
    return out.reshape(orig_shape)


class BCCClassifier:
    """JAX/Pallas counterpart of the (abstract) PyTorch BCCClassifier."""

    def __init__(self):
        # The reference __init__ registers no parameters.
        pass

    def forward(self, x: jax.Array) -> jax.Array:
        # Accepts any shape (NCHW in the classifier convention); flattened to
        # a lane-dense (rows, cols) slab inside one jitted computation and
        # reshaped back on return.
        return _pallas_identity(x)

    def __call__(self, x: jax.Array) -> jax.Array:
        return self.forward(x)

    def get_weight_reg_loss(self) -> jax.Array:
        # TODO(synk): undefined in the reference (NotImplementedError); the
        # module has no weights, so a zero scalar is the only well-defined value.
        return jnp.zeros((), dtype=jnp.float32)


if __name__ == "__main__":
    key = jax.random.PRNGKey(0)
    model = BCCClassifier()

    # Small NCHW input consistent with an image-classifier module.
    x = jax.random.normal(key, (2, 4, 16, 16), dtype=jnp.float32)
    y = jax.block_until_ready(model.forward(x))
    assert y.shape == x.shape
    assert bool(jnp.allclose(y, x))

    # Odd (non-128-divisible) shape to exercise the padding path.
    k2 = jax.random.PRNGKey(1)
    x_odd = jax.random.normal(k2, (2, 3, 5, 7), dtype=jnp.float32)
    y_odd = jax.block_until_ready(model.forward(x_odd))
    assert y_odd.shape == x_odd.shape
    assert bool(jnp.allclose(y_odd, x_odd))

    reg = jax.block_until_ready(model.get_weight_reg_loss())
    assert reg.shape == ()

    print("KERNEL_OK")
</pallas_src>

<mosaic_0001>
module attributes {stable_mosaic.version = 11 : i64} {
  func.func @_identity_kernel(%arg0: i32, %arg1: memref<1x2048xf32, #tpu.memory_space<vmem>>, %arg2: memref<1x2048xf32, #tpu.memory_space<vmem>>) attributes {dimension_semantics = [#tpu.dimension_semantics<parallel>], iteration_bounds = array<i64: 1>, scalar_prefetch = 0 : i64, scratch_operands = 0 : i64, tpu.core_type = #tpu.core_type<tc>, window_params = [{transform_indices = @transform_0, window_bounds = array<i64: 1, 2048>}, {transform_indices = @transform_1, window_bounds = array<i64: 1, 2048>}]} {
    %c0 = arith.constant 0 : index
    %c0_0 = arith.constant 0 : index
    %0 = vector.load %arg1[%c0, %c0_0] : memref<1x2048xf32, #tpu.memory_space<vmem>>, vector<1x2048xf32>
    %c0_1 = arith.constant 0 : index
    %c0_2 = arith.constant 0 : index
    %1 = vector.load %arg2[%c0_1, %c0_2] : memref<1x2048xf32, #tpu.memory_space<vmem>>, vector<1x2048xf32>
    tpu.vector_store %arg2[%c0_1, %c0_2], %0 {strides = array<i32>} : memref<1x2048xf32, #tpu.memory_space<vmem>>, vector<1x2048xf32>,
    return
  }
  func.func @transform_0(%arg0: i32) -> (i32, i32) {
    %c0_i32 = arith.constant 0 : i32
    %c0_i32_0 = arith.constant 0 : i32
    return %arg0, %c0_i32 : i32, i32
  }
  func.func @transform_1(%arg0: i32) -> (i32, i32) {
    %c0_i32 = arith.constant 0 : i32
    %c0_i32_0 = arith.constant 0 : i32
    return %arg0, %c0_i32 : i32, i32
  }
}

</mosaic_0001>

<bundles_post_ra>
// kernel: _pallas_identity.1
= control target key start
LH: loop header
LB: loop body
LE: loop exit
PB: predicated region body
PF: predicated region fallthrough
CT: control target
= control target key end

     0   :  { %s38_s0 = inlined_call_operand.vmem [shape: f32[1,2048], index: 0, kind: input, shape index: {}]   ;;  %s39_s1 = inlined_call_operand.vmem [shape: f32[1,2048], index: 1, kind: output, shape index: {}]  }
   0x1   :  { %v8_v0 = vld [vmem:[%s38_s0] sm:$0xff]  ;;  %v9_v1 = vld [vmem:[%s38_s0 + $0x8] sm:$0xff] }
   0x2   :  { %10 = vst [vmem:[%s39_s1] sm:$0xff] %v8_v0  ;;  %11 = vst [vmem:[%s39_s1 + $0x8] sm:$0xff] %v9_v1 }

</bundles_post_ra>
